<compile_context>
chip_gen: v7x
topology: tpu7x:2x2x1
jax: 0.10.0
libtpu: 0.0.40
codegen_flags: <defaults>
</compile_context>

<pallas_src>
import jax
import jax.numpy as jnp
from jax.experimental import pallas as pl
from jax.experimental.pallas import tpu as pltpu


def _outconv_kernel(x_ref, w_ref, b_ref, o_ref):
    # x_ref: (1, Cin, tM)  VMEM  -- lane-dense spatial tile (native NCHW view)
    # w_ref: (Cout, Cin)   SMEM  -- scalar weights
    # b_ref: (Cout,)       SMEM  -- scalar bias
    # o_ref: (1, Cout, tM) VMEM
    cin = x_ref.shape[1]
    cout = o_ref.shape[1]
    for co in range(cout):
        # Unrolled VPU FMA over input channels; scalar weights splat from SMEM.
        acc = x_ref[0, 0:1, :].astype(jnp.float32) * w_ref[co, 0]
        for ci in range(1, cin):
            acc = acc + x_ref[0, ci:ci + 1, :].astype(jnp.float32) * w_ref[co, ci]
        acc = acc + b_ref[co]
        # sigmoid(z) = 1 / (1 + exp(-z)): exp and reciprocal both run on the EUP.
        y = pl.reciprocal(1.0 + jnp.exp(-acc), approx=True)
        o_ref[0, co:co + 1, :] = y.astype(o_ref.dtype)


def _pick_m_tile(hw, cap=8192):
    """Largest lane-dense tile that divides H*W (multiple of 128 when possible)."""
    if hw % 128 != 0:
        return hw  # full-extent block along the last dim is always legal
    t = hw
    while t > cap and t % 256 == 0:
        t //= 2
    return t


@jax.jit
def outconv_pallas(x_nchw, weight, bias):
    """x_nchw: (N, Cin, H, W); weight: (Cout, Cin); bias: (Cout,)."""
    N, Cin, H, W = x_nchw.shape
    Cout = weight.shape[0]
    HW = H * W

    # Free reshape (contiguous trailing dims): NCHW -> (N, Cin, H*W).
    x3 = x_nchw.reshape(N, Cin, HW)
    w_s = weight.astype(jnp.float32)   # (Cout, Cin) -> SMEM scalars
    b_s = bias.astype(jnp.float32)     # (Cout,)     -> SMEM scalars

    tm = _pick_m_tile(HW)
    grid = (N, HW // tm)

    out3 = pl.pallas_call(
        _outconv_kernel,
        out_shape=jax.ShapeDtypeStruct((N, Cout, HW), x_nchw.dtype),
        grid_spec=pltpu.PrefetchScalarGridSpec(
            num_scalar_prefetch=0,
            grid=grid,
            in_specs=[
                # Lane-dense spatial tile of x in native layout.
                pl.BlockSpec((1, Cin, tm), lambda n, m: (n, 0, m)),
                # Tiny weights/bias live as resident scalars in SMEM.
                pl.BlockSpec(memory_space=pltpu.MemorySpace.SMEM),
                pl.BlockSpec(memory_space=pltpu.MemorySpace.SMEM),
            ],
            out_specs=pl.BlockSpec((1, Cout, tm), lambda n, m: (n, 0, m)),
        ),
        compiler_params=pltpu.CompilerParams(
            dimension_semantics=("parallel", "parallel"),
        ),
    )(x3, w_s, b_s)

    # Free reshape back: (N, Cout, H*W) -> (N, Cout, H, W).
    return out3.reshape(N, Cout, H, W)


if __name__ == "__main__":
    # Module: outconv(in_channels=4, out_channels=3); input NCHW (2, 4, 16, 16)
    N, Cin, Cout, H, W = 2, 4, 3, 16, 16

    key = jax.random.PRNGKey(0)
    kx, kw, kb = jax.random.split(key, 3)

    x = jax.random.normal(kx, (N, Cin, H, W), dtype=jnp.float32)
    # Conv2d 1x1 weight (Cout, Cin, 1, 1) -> squeezed to (Cout, Cin)
    weight = jax.random.normal(kw, (Cout, Cin), dtype=jnp.float32) * 0.1
    bias = jax.random.normal(kb, (Cout,), dtype=jnp.float32) * 0.1

    y = outconv_pallas(x, weight, bias)
    y = jax.block_until_ready(y)

    # Plain-JAX reference (tolerance widened slightly for approx reciprocal).
    ref = jax.nn.sigmoid(
        jnp.einsum("nchw,oc->nohw", x, weight) + bias[None, :, None, None]
    )
    assert y.shape == (N, Cout, H, W)
    assert jnp.allclose(y, ref, atol=2e-3, rtol=2e-3), float(
        jnp.max(jnp.abs(y - ref))
    )

    print("KERNEL_OK")
</pallas_src>

<mosaic_0001>
module attributes {stable_mosaic.version = 11 : i64} {
  func.func @_outconv_kernel(%arg0: i32, %arg1: i32, %arg2: memref<1x4x256xf32, #tpu.memory_space<vmem>>, %arg3: memref<3x4xf32, #tpu.memory_space<smem>>, %arg4: memref<3xf32, #tpu.memory_space<smem>>, %arg5: memref<1x3x256xf32, #tpu.memory_space<vmem>>) attributes {dimension_semantics = [#tpu.dimension_semantics<parallel>, #tpu.dimension_semantics<parallel>], iteration_bounds = array<i64: 2, 1>, scalar_prefetch = 0 : i64, scratch_operands = 0 : i64, tpu.core_type = #tpu.core_type<tc>, window_params = [{transform_indices = @transform_0, window_bounds = array<i64: 1, 4, 256>}, {transform_indices = @transform_1, window_bounds = array<i64: 3, 4>}, {transform_indices = @transform_2, window_bounds = array<i64: 3>}, {transform_indices = @transform_3, window_bounds = array<i64: 1, 3, 256>}]} {
    %c0 = arith.constant 0 : index
    %c0_0 = arith.constant 0 : index
    %c0_1 = arith.constant 0 : index
    %0 = vector.load %arg2[%c0, %c0_0, %c0_1] : memref<1x4x256xf32, #tpu.memory_space<vmem>>, vector<1x1x256xf32>
    %1 = vector.shape_cast %0 : vector<1x1x256xf32> to vector<1x256xf32>
    %c0_2 = arith.constant 0 : index
    %c0_3 = arith.constant 0 : index
    %2 = memref.load %arg3[%c0_2, %c0_3] : memref<3x4xf32, #tpu.memory_space<smem>>
    %3 = vector.broadcast %2 : f32 to vector<1x256xf32>
    %4 = arith.mulf %1, %3 : vector<1x256xf32>
    %c0_4 = arith.constant 0 : index
    %c1 = arith.constant 1 : index
    %c0_5 = arith.constant 0 : index
    %5 = vector.load %arg2[%c0_4, %c1, %c0_5] : memref<1x4x256xf32, #tpu.memory_space<vmem>>, vector<1x1x256xf32>
    %6 = vector.shape_cast %5 : vector<1x1x256xf32> to vector<1x256xf32>
    %c0_6 = arith.constant 0 : index
    %c1_7 = arith.constant 1 : index
    %7 = memref.load %arg3[%c0_6, %c1_7] : memref<3x4xf32, #tpu.memory_space<smem>>
    %8 = vector.broadcast %7 : f32 to vector<1x256xf32>
    %9 = arith.mulf %6, %8 : vector<1x256xf32>
    %10 = arith.addf %4, %9 : vector<1x256xf32>
    %c0_8 = arith.constant 0 : index
    %c2 = arith.constant 2 : index
    %c0_9 = arith.constant 0 : index
    %11 = vector.load %arg2[%c0_8, %c2, %c0_9] : memref<1x4x256xf32, #tpu.memory_space<vmem>>, vector<1x1x256xf32>
    %12 = vector.shape_cast %11 : vector<1x1x256xf32> to vector<1x256xf32>
    %c0_10 = arith.constant 0 : index
    %c2_11 = arith.constant 2 : index
    %13 = memref.load %arg3[%c0_10, %c2_11] : memref<3x4xf32, #tpu.memory_space<smem>>
    %14 = vector.broadcast %13 : f32 to vector<1x256xf32>
    %15 = arith.mulf %12, %14 : vector<1x256xf32>
    %16 = arith.addf %10, %15 : vector<1x256xf32>
    %c0_12 = arith.constant 0 : index
    %c3 = arith.constant 3 : index
    %c0_13 = arith.constant 0 : index
    %17 = vector.load %arg2[%c0_12, %c3, %c0_13] : memref<1x4x256xf32, #tpu.memory_space<vmem>>, vector<1x1x256xf32>
    %18 = vector.shape_cast %17 : vector<1x1x256xf32> to vector<1x256xf32>
    %c0_14 = arith.constant 0 : index
    %c3_15 = arith.constant 3 : index
    %19 = memref.load %arg3[%c0_14, %c3_15] : memref<3x4xf32, #tpu.memory_space<smem>>
    %20 = vector.broadcast %19 : f32 to vector<1x256xf32>
    %21 = arith.mulf %18, %20 : vector<1x256xf32>
    %22 = arith.addf %16, %21 : vector<1x256xf32>
    %c0_16 = arith.constant 0 : index
    %23 = memref.load %arg4[%c0_16] : memref<3xf32, #tpu.memory_space<smem>>
    %24 = vector.broadcast %23 : f32 to vector<1x256xf32>
    %25 = arith.addf %22, %24 : vector<1x256xf32>
    %cst = arith.constant 0.000000e+00 : f32
    %26 = vector.broadcast %cst : f32 to vector<1x256xf32>
    %27 = arith.subf %26, %25 : vector<1x256xf32>
    %28 = math.exp %27 : vector<1x256xf32>
    %cst_17 = arith.constant 1.000000e+00 : f32
    %29 = vector.broadcast %cst_17 : f32 to vector<1x256xf32>
    %30 = arith.addf %29, %28 : vector<1x256xf32>
    %31 = tpu.reciprocal %30 {approx = true} : vector<1x256xf32> -> vector<1x256xf32>
    %c0_18 = arith.constant 0 : index
    %c0_19 = arith.constant 0 : index
    %c0_20 = arith.constant 0 : index
    %32 = vector.load %arg5[%c0_18, %c0_19, %c0_20] : memref<1x3x256xf32, #tpu.memory_space<vmem>>, vector<1x1x256xf32>
    %33 = vector.shape_cast %32 : vector<1x1x256xf32> to vector<1x256xf32>
    %34 = vector.shape_cast %31 : vector<1x256xf32> to vector<1x1x256xf32>
    tpu.vector_store %arg5[%c0_18, %c0_19, %c0_20], %34 {strides = array<i32>} : memref<1x3x256xf32, #tpu.memory_space<vmem>>, vector<1x1x256xf32>,
    %c0_21 = arith.constant 0 : index
    %c0_22 = arith.constant 0 : index
    %c0_23 = arith.constant 0 : index
    %35 = vector.load %arg2[%c0_21, %c0_22, %c0_23] : memref<1x4x256xf32, #tpu.memory_space<vmem>>, vector<1x1x256xf32>
    %36 = vector.shape_cast %35 : vector<1x1x256xf32> to vector<1x256xf32>
    %c1_24 = arith.constant 1 : index
    %c0_25 = arith.constant 0 : index
    %37 = memref.load %arg3[%c1_24, %c0_25] : memref<3x4xf32, #tpu.memory_space<smem>>
    %38 = vector.broadcast %37 : f32 to vector<1x256xf32>
    %39 = arith.mulf %36, %38 : vector<1x256xf32>
    %c0_26 = arith.constant 0 : index
    %c1_27 = arith.constant 1 : index
    %c0_28 = arith.constant 0 : index
    %40 = vector.load %arg2[%c0_26, %c1_27, %c0_28] : memref<1x4x256xf32, #tpu.memory_space<vmem>>, vector<1x1x256xf32>
    %41 = vector.shape_cast %40 : vector<1x1x256xf32> to vector<1x256xf32>
    %c1_29 = arith.constant 1 : index
    %c1_30 = arith.constant 1 : index
    %42 = memref.load %arg3[%c1_29, %c1_30] : memref<3x4xf32, #tpu.memory_space<smem>>
    %43 = vector.broadcast %42 : f32 to vector<1x256xf32>
    %44 = arith.mulf %41, %43 : vector<1x256xf32>
    %45 = arith.addf %39, %44 : vector<1x256xf32>
    %c0_31 = arith.constant 0 : index
    %c2_32 = arith.constant 2 : index
    %c0_33 = arith.constant 0 : index
    %46 = vector.load %arg2[%c0_31, %c2_32, %c0_33] : memref<1x4x256xf32, #tpu.memory_space<vmem>>, vector<1x1x256xf32>
    %47 = vector.shape_cast %46 : vector<1x1x256xf32> to vector<1x256xf32>
    %c1_34 = arith.constant 1 : index
    %c2_35 = arith.constant 2 : index
    %48 = memref.load %arg3[%c1_34, %c2_35] : memref<3x4xf32, #tpu.memory_space<smem>>
    %49 = vector.broadcast %48 : f32 to vector<1x256xf32>
    %50 = arith.mulf %47, %49 : vector<1x256xf32>
    %51 = arith.addf %45, %50 : vector<1x256xf32>
    %c0_36 = arith.constant 0 : index
    %c3_37 = arith.constant 3 : index
    %c0_38 = arith.constant 0 : index
    %52 = vector.load %arg2[%c0_36, %c3_37, %c0_38] : memref<1x4x256xf32, #tpu.memory_space<vmem>>, vector<1x1x256xf32>
    %53 = vector.shape_cast %52 : vector<1x1x256xf32> to vector<1x256xf32>
    %c1_39 = arith.constant 1 : index
    %c3_40 = arith.constant 3 : index
    %54 = memref.load %arg3[%c1_39, %c3_40] : memref<3x4xf32, #tpu.memory_space<smem>>
    %55 = vector.broadcast %54 : f32 to vector<1x256xf32>
    %56 = arith.mulf %53, %55 : vector<1x256xf32>
    %57 = arith.addf %51, %56 : vector<1x256xf32>
    %c1_41 = arith.constant 1 : index
    %58 = memref.load %arg4[%c1_41] : memref<3xf32, #tpu.memory_space<smem>>
    %59 = vector.broadcast %58 : f32 to vector<1x256xf32>
    %60 = arith.addf %57, %59 : vector<1x256xf32>
    %cst_42 = arith.constant 0.000000e+00 : f32
    %61 = vector.broadcast %cst_42 : f32 to vector<1x256xf32>
    %62 = arith.subf %61, %60 : vector<1x256xf32>
    %63 = math.exp %62 : vector<1x256xf32>
    %cst_43 = arith.constant 1.000000e+00 : f32
    %64 = vector.broadcast %cst_43 : f32 to vector<1x256xf32>
    %65 = arith.addf %64, %63 : vector<1x256xf32>
    %66 = tpu.reciprocal %65 {approx = true} : vector<1x256xf32> -> vector<1x256xf32>
    %c0_44 = arith.constant 0 : index
    %c1_45 = arith.constant 1 : index
    %c0_46 = arith.constant 0 : index
    %67 = vector.load %arg5[%c0_44, %c1_45, %c0_46] : memref<1x3x256xf32, #tpu.memory_space<vmem>>, vector<1x1x256xf32>
    %68 = vector.shape_cast %67 : vector<1x1x256xf32> to vector<1x256xf32>
    %69 = vector.shape_cast %66 : vector<1x256xf32> to vector<1x1x256xf32>
    tpu.vector_store %arg5[%c0_44, %c1_45, %c0_46], %69 {strides = array<i32>} : memref<1x3x256xf32, #tpu.memory_space<vmem>>, vector<1x1x256xf32>,
    %c0_47 = arith.constant 0 : index
    %c0_48 = arith.constant 0 : index
    %c0_49 = arith.constant 0 : index
    %70 = vector.load %arg2[%c0_47, %c0_48, %c0_49] : memref<1x4x256xf32, #tpu.memory_space<vmem>>, vector<1x1x256xf32>
    %71 = vector.shape_cast %70 : vector<1x1x256xf32> to vector<1x256xf32>
    %c2_50 = arith.constant 2 : index
    %c0_51 = arith.constant 0 : index
    %72 = memref.load %arg3[%c2_50, %c0_51] : memref<3x4xf32, #tpu.memory_space<smem>>
    %73 = vector.broadcast %72 : f32 to vector<1x256xf32>
    %74 = arith.mulf %71, %73 : vector<1x256xf32>
    %c0_52 = arith.constant 0 : index
    %c1_53 = arith.constant 1 : index
    %c0_54 = arith.constant 0 : index
    %75 = vector.load %arg2[%c0_52, %c1_53, %c0_54] : memref<1x4x256xf32, #tpu.memory_space<vmem>>, vector<1x1x256xf32>
    %76 = vector.shape_cast %75 : vector<1x1x256xf32> to vector<1x256xf32>
    %c2_55 = arith.constant 2 : index
    %c1_56 = arith.constant 1 : index
    %77 = memref.load %arg3[%c2_55, %c1_56] : memref<3x4xf32, #tpu.memory_space<smem>>
    %78 = vector.broadcast %77 : f32 to vector<1x256xf32>
    %79 = arith.mulf %76, %78 : vector<1x256xf32>
    %80 = arith.addf %74, %79 : vector<1x256xf32>
    %c0_57 = arith.constant 0 : index
    %c2_58 = arith.constant 2 : index
    %c0_59 = arith.constant 0 : index
    %81 = vector.load %arg2[%c0_57, %c2_58, %c0_59] : memref<1x4x256xf32, #tpu.memory_space<vmem>>, vector<1x1x256xf32>
    %82 = vector.shape_cast %81 : vector<1x1x256xf32> to vector<1x256xf32>
    %c2_60 = arith.constant 2 : index
    %c2_61 = arith.constant 2 : index
    %83 = memref.load %arg3[%c2_60, %c2_61] : memref<3x4xf32, #tpu.memory_space<smem>>
    %84 = vector.broadcast %83 : f32 to vector<1x256xf32>
    %85 = arith.mulf %82, %84 : vector<1x256xf32>
    %86 = arith.addf %80, %85 : vector<1x256xf32>
    %c0_62 = arith.constant 0 : index
    %c3_63 = arith.constant 3 : index
    %c0_64 = arith.constant 0 : index
    %87 = vector.load %arg2[%c0_62, %c3_63, %c0_64] : memref<1x4x256xf32, #tpu.memory_space<vmem>>, vector<1x1x256xf32>
    %88 = vector.shape_cast %87 : vector<1x1x256xf32> to vector<1x256xf32>
    %c2_65 = arith.constant 2 : index
    %c3_66 = arith.constant 3 : index
    %89 = memref.load %arg3[%c2_65, %c3_66] : memref<3x4xf32, #tpu.memory_space<smem>>
    %90 = vector.broadcast %89 : f32 to vector<1x256xf32>
    %91 = arith.mulf %88, %90 : vector<1x256xf32>
    %92 = arith.addf %86, %91 : vector<1x256xf32>
    %c2_67 = arith.constant 2 : index
    %93 = memref.load %arg4[%c2_67] : memref<3xf32, #tpu.memory_space<smem>>
    %94 = vector.broadcast %93 : f32 to vector<1x256xf32>
    %95 = arith.addf %92, %94 : vector<1x256xf32>
    %cst_68 = arith.constant 0.000000e+00 : f32
    %96 = vector.broadcast %cst_68 : f32 to vector<1x256xf32>
    %97 = arith.subf %96, %95 : vector<1x256xf32>
    %98 = math.exp %97 : vector<1x256xf32>
    %cst_69 = arith.constant 1.000000e+00 : f32
    %99 = vector.broadcast %cst_69 : f32 to vector<1x256xf32>
    %100 = arith.addf %99, %98 : vector<1x256xf32>
    %101 = tpu.reciprocal %100 {approx = true} : vector<1x256xf32> -> vector<1x256xf32>
    %c0_70 = arith.constant 0 : index
    %c2_71 = arith.constant 2 : index
    %c0_72 = arith.constant 0 : index
    %102 = vector.load %arg5[%c0_70, %c2_71, %c0_72] : memref<1x3x256xf32, #tpu.memory_space<vmem>>, vector<1x1x256xf32>
    %103 = vector.shape_cast %102 : vector<1x1x256xf32> to vector<1x256xf32>
    %104 = vector.shape_cast %101 : vector<1x256xf32> to vector<1x1x256xf32>
    tpu.vector_store %arg5[%c0_70, %c2_71, %c0_72], %104 {strides = array<i32>} : memref<1x3x256xf32, #tpu.memory_space<vmem>>, vector<1x1x256xf32>,
    return
  }
  func.func @transform_0(%arg0: i32, %arg1: i32) -> (i32, i32, i32) {
    %c0_i32 = arith.constant 0 : i32
    %c0_i32_0 = arith.constant 0 : i32
    return %arg0, %c0_i32, %arg1 : i32, i32, i32
  }
  func.func @transform_1(%arg0: i32, %arg1: i32) -> (i32, i32) {
    %c0_i32 = arith.constant 0 : i32
    %c0_i32_0 = arith.constant 0 : i32
    %c0_i32_1 = arith.constant 0 : i32
    return %c0_i32, %c0_i32_0 : i32, i32
  }
  func.func @transform_2(%arg0: i32, %arg1: i32) -> i32 {
    %c0_i32 = arith.constant 0 : i32
    %c0_i32_0 = arith.constant 0 : i32
    return %c0_i32 : i32
  }
  func.func @transform_3(%arg0: i32, %arg1: i32) -> (i32, i32, i32) {
    %c0_i32 = arith.constant 0 : i32
    %c0_i32_0 = arith.constant 0 : i32
    return %arg0, %c0_i32, %arg1 : i32, i32, i32
  }
}

</mosaic_0001>

<bundles_post_ra>
// kernel: outconv_pallas.1
= control target key start
LH: loop header
LB: loop body
LE: loop exit
PB: predicated region body
PF: predicated region fallthrough
CT: control target
= control target key end

     0   :  { %8 = vsyncpa [#allocation3], 0  ;;  %s724_s0 = inlined_call_operand.vmem [shape: f32[2,4,256], index: 0, kind: input, shape index: {}]   ;;  %s725_s1 = inlined_call_operand.vmem [shape: f32[3,4], index: 1, kind: input, shape index: {}]   ;;  %s726_s2 = inlined_call_operand.vmem [shape: f32[3], index: 2, kind: input, shape index: {}]   ;;  %s727_s3 = inlined_call_operand.vmem [shape: f32[2,3,256], index: 3, kind: output, shape index: {}]  }
   0x1   :  { %9 = vsyncpa [#allocation5], 0  ;;  %s621_s12 = smov 0   ;;  %s623_s13 = smov 0  }
   0x2   :  { %s625_s14 = smov 0  }
   0x3 LB: > { %s439_s15 = sadd.s32 4294967295, %s597_s14   ;;  %s27_s16 = sadd.s32 1, %s593_s13  ;;  %s597_s14 = sphi %s625_s14, %s15_s14   ;;  %s593_s13 = sphi %s623_s13, %s737_s13   ;;  %s589_s12 = sphi %s621_s12, %s736_s12  }
   0x4   : > { %p29_p0 = scmp.ge.s32.totalorder %s27_s16, 2  ;;  %p441_p1 = scmp.ge.s32.totalorder %s597_s14, 1 }
   0x5   : > { %p130_p2 = scmp.lt.s32.totalorder %s597_s14, 3  ;;  %p646_p4 = scmp.eq.s32.totalorder %s439_s15, 0 }
   0x6   : > { %s739_s16 = smov (%p29_p0, %s27_s16), 0  ;;  %s143_s21 = sshll.u32 %s725_s1, 4  ;;  %s144_s21 = int_to_ptr.vmem [resolvable:$true] %s143_s21 }
   0x7   : > { %p642_p3 = pnand %p441_p1, %p130_p2  ;;  %s154_s24 = sshll.u32 %s726_s2, 4  ;;  %s155_s24 = int_to_ptr.vmem [resolvable:$true] %s154_s24 }
   0x8   : > { %s732_s18 = scalar_select %p646_p4, 1, 0 }
   0x9   : > { %s731_s17 = scalar_select %p642_p3, 1, 0 }
   0xa   : > { %p488_p5 = pneg %p642_p3  ;;  %s537_s26 = scalar_lea.vmem %s144_s21, 64 }
   0xb   : > { %p538_p7 = scmp.ne.s32.totalorder %s144_s21, %s537_s26  ;;  %p545_p11 = scmp.lt.s32.totalorder %s144_s21, %s144_s21 }
   0xc   : > { %p660_p6 = pnand %p646_p4, %p488_p5  ;;  %p546_p12 = scmp.lt.s32.totalorder %s537_s26, %s537_s26 }
   0xe   : > { %p539_p8 = pneg %p660_p6  ;;  %p547_p13 = por %p546_p12, %p545_p11 }
  0x10   : > { %p540_p9 = pnand %p539_p8, %p538_p7 }
  0x12   : > { %p541_p10 = pneg %p540_p9 }
  0x14   : > { %p548_p0 = pnand %p547_p13, %p541_p10 }
  0x16   : > { %551 = shalt.err (!%p548_p0)
}
  0x17   : > { %s599_s27 = smov [#allocation2]   ;;  %s552_s28 = scalar_lea.vmem %s155_s24, 16 }
  0x18   : > { %491 = dma.vmem_to_smem (!%p660_p6), %s144_s21, 64, %s599_s27, [#allocation3]  }
  0x19   : > { %p553_p1 = scmp.ne.s32.totalorder %s155_s24, %s552_s28  ;;  %p560_p4 = scmp.lt.s32.totalorder %s155_s24, %s155_s24 }
  0x1a   : > { %p561_p3 = scmp.lt.s32.totalorder %s552_s28, %s552_s28 }
  0x1b   : > { %p555_p2 = pnand %p553_p1, %p539_p8 }
  0x1c   : > { %p562_p7 = por %p561_p3, %p560_p4 }
  0x1d   : > { %p556_p5 = pneg %p555_p2 }
  0x1f   : > { %p563_p9 = pnand %p562_p7, %p556_p5 }
  0x21   : > { %566 = shalt.err (!%p563_p9)
}
  0x22   : > { %s600_s29 = smov [#allocation4]   ;;  %p734_p10 = scmp.ne.s32.totalorder %s731_s17, 0 }
  0x23   : > { %494 = dma.vmem_to_smem (!%p660_p6), %s155_s24, 16, %s600_s29, [#allocation5]  }
  0x24   : > { %180 = sbr.rel (%p734_p10) target bundleno = 104 (0x68), region = 32  ;;  %p735_p11 = scmp.ne.s32.totalorder (!%p734_p10), %s732_s18, 0 }
  0x2b   : > { %580 = dma.done.wait (%p735_p11), [#allocation3], 64  }
  0x2c   : > { %582 = vsyncadd (%p735_p11), [#allocation3], 4294967232 }
  0x2d   : > { %584 = dma.done.wait (%p735_p11), [#allocation5], 16  }
  0x2e   : > { %586 = vsyncadd (%p735_p11), [#allocation5], 4294967280 }
  0x2f   : > { %190 = sfence }
  0x30   : > { %p218_p3 = scmp.lt.s32.totalorder %s589_s12, 1  ;;  %s238_s30 = sld [smem:[#allocation2]]  ;;  %v267_v59 = vlaneseq }
  0x31   : > { %s453_s4 = sld [smem:[#allocation2 + $0x1]]  ;;  %s455_s5 = sld [smem:[#allocation2 + $0x2]] }
  0x32   : > { %s741_s12 = smov (!%p218_p3, %s589_s12), 1  ;;  %s457_s6 = sld [smem:[#allocation2 + $0x3]]  ;;  %vm269_vm0 = vcmp.lt.s32.totalorder %v267_v59, 256 }
  0x33   : > { %s478_s7 = sshll.u32 %s741_s12, 3  ;;  %s458_s8 = sld [smem:[#allocation2 + $0x80]] }
  0x34   : > { %s690_s11 = scalar_lea.vmem %s724_s0, %s478_s7  ;;  %s692_s15 = sld [smem:[#allocation4]] }
  0x35   : > { %v237_v0 = vld [vmem:[%s690_s11] ss:$4 sm:$0x3]  ;;  %v452_v2 = vld [vmem:[%s690_s11 + $0x1] ss:$4 sm:$0x3]  ;;  %s235_s28 = scalar_lea.vmem %s727_s3, %s478_s7 }
  0x36   : > { %v239_v1 = vstv %s238_s30  ;;  %v454_v5 = vld [vmem:[%s690_s11 + $0x2] ss:$4 sm:$0x3]  ;;  %v456_v7 = vld [vmem:[%s690_s11 + $0x3] ss:$4 sm:$0x3] }
  0x37   : > { %v240_v3 = vmul.f32 %v239_v1, %v237_v0  ;;  %v244_v4 = vstv %s453_s4  ;;  %v250_v6 = vstv %s455_s5  ;;  %s460_s17 = sld [smem:[#allocation2 + $0x81]]  ;;  %s462_s18 = sld [smem:[#allocation2 + $0x82]]  ;;  %v272_v13 = vld [vmem:[%s690_s11] ss:$4 sm:$0x3] }
  0x38   : > { %v245_v8 = vmul.f32 %v452_v2, %v244_v4  ;;  %v251_v9 = vmul.f32 %v454_v5, %v250_v6  ;;  %v256_v10 = vstv %s457_s6  ;;  %s464_s19 = sld [smem:[#allocation2 + $0x83]]  ;;  %v459_v16 = vld [vmem:[%s690_s11 + $0x1] ss:$4 sm:$0x3]  ;;  %s467_s20 = sld [smem:[#allocation2 + $0x100]] }
  0x39   : > { %v257_v12 = vmul.f32 %v456_v7, %v256_v10  ;;  %v274_v14 = vstv %s458_s8  ;;  %s701_s21 = sld [smem:[#allocation4 + $0x1]]  ;;  %v461_v20 = vld [vmem:[%s690_s11 + $0x2] ss:$4 sm:$0x3]  ;;  %s471_s23 = sld [smem:[#allocation2 + $0x102]] }
  0x3a   : > { %v246_v11 = vadd.f32 %v245_v8, %v240_v3  ;;  %v260_v17 = vstv %s692_s15  ;;  %s469_s22 = sld [smem:[#allocation2 + $0x101]]  ;;  %v275_v19 = vmul.f32 %v274_v14, %v272_v13  ;;  %v463_v22 = vld [vmem:[%s690_s11 + $0x3] ss:$4 sm:$0x3]  ;;  %s473_s24 = sld [smem:[#allocation2 + $0x103]] }
  0x3b   : > { %v301_v26 = vld [vmem:[%s690_s11] ss:$4 sm:$0x3]  ;;  %v468_v29 = vld [vmem:[%s690_s11 + $0x1] ss:$4 sm:$0x3] }
  0x3c   : > { %v252_v15 = vadd.f32 %v251_v9, %v246_v11  ;;  %s474_s25 = sld [smem:[#allocation4 + $0x2]]  ;;  %v470_v34 = vld [vmem:[%s690_s11 + $0x2] ss:$4 sm:$0x3] }
  0x3d   : > { %v278_v21 = vstv %s460_s17  ;;  %v283_v25 = vstv %s462_s18  ;;  %v472_v37 = vld [vmem:[%s690_s11 + $0x3] ss:$4 sm:$0x3] }
  0x3e   : > { %v258_v18 = vadd.f32 %v257_v12, %v252_v15  ;;  %v279_v24 = vmul.f32 %v459_v16, %v278_v21  ;;  %v284_v27 = vmul.f32 %v461_v20, %v283_v25  ;;  %v288_v28 = vstv %s464_s19 }
  0x3f   : > { %v289_v32 = vmul.f32 %v463_v22, %v288_v28  ;;  %v303_v33 = vstv %s467_s20  ;;  %v312_v41 = vstv %s471_s23  ;;  %v292_v42 = vstv %s701_s21 }
  0x40   : > { %v261_v23 = vadd.f32 %v260_v17, %v258_v18  ;;  %v280_v31 = vadd.f32 %v279_v24, %v275_v19  ;;  %v304_v35 = vmul.f32 %v303_v33, %v301_v26  ;;  %v307_v36 = vstv %s469_s22 }
  0x41   : > { %v308_v40 = vmul.f32 %v468_v29, %v307_v36  ;;  %v313_v43 = vmul.f32 %v470_v34, %v312_v41  ;;  %v317_v44 = vstv %s473_s24 }
  0x42   : > { %v262_v30 = vsub.f32 0.0, %v261_v23  ;;  %v285_v39 = vadd.f32 %v284_v27, %v280_v31  ;;  %v318_v47 = vmul.f32 %v472_v37, %v317_v44  ;;  %v321_v50 = vstv %s474_s25 }
  0x43   : > { %v309_v46 = vadd.f32 %v308_v40, %v304_v35 }
  0x44   : > { %v263_v38 = vmul.f32 1.442695, %v262_v30  ;;  %v290_v45 = vadd.f32 %v289_v32, %v285_v39 }
  0x45   : > { %v314_v49 = vadd.f32 %v313_v43, %v309_v46 }
  0x46   : > { %525 = vpow2.f32 %v263_v38  ;;  %v293_v48 = vadd.f32 %v292_v42, %v290_v45 }
  0x47   : > { %v319_v52 = vadd.f32 %v318_v47, %v314_v49 }
  0x48   : > { %v294_v51 = vsub.f32 0.0, %v293_v48 }
  0x49   : > { %v322_v54 = vadd.f32 %v321_v50, %v319_v52 }
  0x4a   : > { %v295_v53 = vmul.f32 1.442695, %v294_v51 }
  0x4b   : > { %v323_v55 = vsub.f32 0.0, %v322_v54 }
  0x4c   : > { %527 = vpow2.f32 %v295_v53 }
  0x4d   : > { %v324_v57 = vmul.f32 1.442695, %v323_v55 }
  0x4f   : > { %529 = vpow2.f32 %v324_v57 }
  0x50   : > { %v526_v56 = vpop.eup %525 }
  0x51   : > { %v265_v58 = vadd.f32 1.0, %v526_v56 }
  0x53   : > { %531 = vrcp.f32 %v265_v58 }
  0x56   : > { %v528_v60 = vpop.eup %527 }
  0x57   : > { %v297_v61 = vadd.f32 1.0, %v528_v60 }
  0x59   : > { %533 = vrcp.f32 %v297_v61  ;;  %v530_v62 = vpop.eup %529 }
  0x5a   : > { %v326_v0 = vadd.f32 1.0, %v530_v62 }
  0x5c   : > { %535 = vrcp.f32 %v326_v0 }
  0x5d   : > { %v532_v63 = vpop.eup %531 }
  0x5e   : > { %271 = vst.msk [vmem:[%s235_s28] ss:$4 sm:$0x3] %vm269_vm0, %v532_v63 }
  0x63   : > { %v534_v1 = vpop.eup %533 }
  0x64   : > { %466 = vst.msk [vmem:[%s235_s28 + $0x1] ss:$4 sm:$0x3] %vm269_vm0, %v534_v1 }
  0x66   : > { %v536_v2 = vpop.eup %535 }
  0x67   : > { %475 = vst.msk [vmem:[%s235_s28 + $0x2] ss:$4 sm:$0x3] %vm269_vm0, %v536_v2 }
  0x68 PF: > { %s15_s14 = sadd.s32 1, %s597_s14   ;;  %s736_s12 = smov %s593_s13 }
  0x69   : > { %p12_p4 = scmp.ge.s32.totalorder %s15_s14, 4   ;;  %s737_s13 = smov %s739_s16 }
  0x6b   :  { %14 = sbr.rel (!%p12_p4) target bundleno = 3 (0x3), region = 76 }
  0x72   :  { %360 = vsyncpa [#allocation3], 1 }
  0x73   :  { %362 = vsyncpa [#allocation3 + $0x1], 1 }
  0x74   :  { %363 = vsyncpa [#allocation5], 1 }

</bundles_post_ra>
